<compile_context>
chip_gen: v6e
topology: v6e:2x2x1
jax: 0.10.0
libtpu: 0.0.40
codegen_flags: <defaults>
</compile_context>

<pallas_src>
import jax
import jax.numpy as jnp
from jax.experimental import pallas as pl
from jax.experimental.pallas import tpu as pltpu


def _round_up(a, m):
    return ((a + m - 1) // m) * m


def _linear_norm_kernel(x_ref, w_ref, b_ref, o_ref):
    # x_ref: (TM, C_in), w_ref: (C_in, D_pad), b_ref: (1, D_pad), o_ref: (TM, D_pad)
    # Standard (M,K)x(K,N) contraction -> MXU, f32 accumulation.
    y = jax.lax.dot_general(
        x_ref[...], w_ref[...],
        dimension_numbers=(((1,), (0,)), ((), ())),
        preferred_element_type=jnp.float32,
    )
    y = y + b_ref[...].astype(jnp.float32)
    # L2 normalize along dim=1 (matches F.normalize(p=2, dim=1, eps=1e-12)):
    #   y / max(||y||, 1e-12)  ==  y * rsqrt(max(sum(y^2), 1e-24))
    # rsqrt goes to the EUP slot instead of VALU sqrt + divide.
    sumsq = jnp.sum(y * y, axis=1, keepdims=True)
    inv = jax.lax.rsqrt(jnp.maximum(sumsq, 1e-24))
    o_ref[...] = (y * inv).astype(o_ref.dtype)


def linear_norm(x, weight, bias, *, max_block_rows=1024):
    """x: (N, C_in); weight: (D, C_in) as in nn.Linear; bias: (D,)."""
    n, c_in = x.shape
    d, c_in_w = weight.shape
    assert c_in == c_in_w and bias.shape == (d,)
    out_dtype = x.dtype

    # Lane-dense output feature dim: pad D up to a multiple of 128. Padded
    # columns get zero weight/bias, so they contribute nothing to the L2 norm.
    d_pad = _round_up(d, 128)

    # Pre-transpose once to (c_in, d_pad). One-time wrapper pass on a small array.
    # TODO(synk): in a real model store the weight pre-transposed/padded so this
    # wrapper pass disappears entirely.
    w_t = weight.T
    if d_pad != d:
        w_t = jnp.pad(w_t, ((0, 0), (0, d_pad - d)))
        bias = jnp.pad(bias, (0, d_pad - d))
    b2 = bias.reshape(1, d_pad)

    # ---- generation-aware VMEM budget ----
    try:
        phys_vmem = int(pltpu.get_tpu_info().vmem_capacity_bytes)
    except Exception:
        phys_vmem = 64 * 1024 * 1024  # conservative (v7x-sized) fallback
    budget = max(32 * 1024 * 1024, int(0.85 * phys_vmem))

    # Resident (single-buffered) weight + bias footprint.
    weight_bytes = c_in * d_pad * jnp.dtype(w_t.dtype).itemsize + d_pad * 4
    if weight_bytes > int(0.45 * budget) and w_t.dtype == jnp.float32:
        # f32 weight can't stay VMEM-resident (matters on v7x's 64 MiB): drop
        # x/weight to bf16, keep f32 MXU accumulation + f32 epilogue.
        # TODO(synk): for weights too large even in bf16, add a K-tiled
        # "arbitrary" grid axis with an f32 accumulator scratch instead.
        w_t = w_t.astype(jnp.bfloat16)
        x = x.astype(jnp.bfloat16)
        weight_bytes = c_in * d_pad * 2 + d_pad * 4

    # Per-row bytes: double-buffered x tile + double-buffered output tile
    # + ~3 f32 epilogue temporaries of width d_pad.
    x_isz = jnp.dtype(x.dtype).itemsize
    o_isz = jnp.dtype(out_dtype).itemsize
    per_row = 2 * (c_in * x_isz + d_pad * o_isz) + 3 * d_pad * 4

    tm = (budget - weight_bytes) // per_row
    tm = max(8, min((int(tm) // 8) * 8, max_block_rows, _round_up(n, 8)))

    grid_m = pl.cdiv(n, tm)
    if grid_m > 1 and grid_m % 2 == 1:
        # v7x megacore: prefer an even number of row tiles so both TensorCores
        # get work; measured-neutral on single-TC v5e/v6e.
        tm = max(8, _round_up(pl.cdiv(n, grid_m + 1), 8))
        grid_m = pl.cdiv(n, tm)

    def run(single_buffer_resident):
        resident_kw = (
            dict(pipeline_mode=pl.Buffered(1)) if single_buffer_resident else {}
        )
        return pl.pallas_call(
            _linear_norm_kernel,
            out_shape=jax.ShapeDtypeStruct((n, d_pad), out_dtype),
            grid=(grid_m,),
            in_specs=[
                # x: streamed over row tiles (double-buffered by the pipeline).
                pl.BlockSpec((tm, c_in), lambda i: (i, 0)),
                # weight: VMEM-resident, constant index map, single-buffered.
                pl.BlockSpec((c_in, d_pad), lambda i: (0, 0), **resident_kw),
                # bias: VMEM-resident, constant index map, single-buffered.
                pl.BlockSpec((1, d_pad), lambda i: (0, 0), **resident_kw),
            ],
            out_specs=pl.BlockSpec((tm, d_pad), lambda i: (i, 0)),
            compiler_params=pltpu.CompilerParams(
                dimension_semantics=("parallel",),  # independent row tiles
                vmem_limit_bytes=budget,
            ),
        )(x, w_t, b2)

    try:
        out = run(True)
    except Exception:
        # Fallback if this runtime rejects pipeline_mode=pl.Buffered(1).
        out = run(False)

    return out if d_pad == d else out[:, :d]


def _init_params(key, in_channels, out_dim):
    # weights_init_kaiming for Linear: kaiming_normal_(fan_out) -> std = sqrt(2/fan_out),
    # bias filled with 0. Deterministic synthetic init (no checkpoint load).
    wkey, _ = jax.random.split(key)
    std = (2.0 / out_dim) ** 0.5
    weight = std * jax.random.normal(wkey, (out_dim, in_channels), dtype=jnp.float32)
    bias = jnp.zeros((out_dim,), dtype=jnp.float32)
    return weight, bias


if __name__ == "__main__":
    key = jax.random.PRNGKey(0)
    kx, kp = jax.random.split(key)

    N, C_IN, DIM = 8, 32, 64          # small shapes: batch=8, in_channels=32, head dim=64
    x = jax.random.normal(kx, (N, C_IN), dtype=jnp.float32)
    weight, bias = _init_params(kp, C_IN, DIM)

    out = jax.block_until_ready(linear_norm(x, weight, bias))
    assert out.shape == (N, DIM)

    # Plain-JAX reference (same math as the PyTorch module).
    y_ref = x @ weight.T + bias
    y_ref = y_ref / jnp.maximum(
        jnp.sqrt(jnp.sum(y_ref * y_ref, axis=1, keepdims=True)), 1e-12
    )
    assert jnp.allclose(out, y_ref, atol=2e-5, rtol=2e-5)

    # bf16 input path (memory-bound production setting): f32 accumulation and
    # f32 norm epilogue inside the kernel, looser tolerance vs f32 reference.
    out_bf16 = jax.block_until_ready(
        linear_norm(x.astype(jnp.bfloat16), weight.astype(jnp.bfloat16), bias)
    )
    assert out_bf16.shape == (N, DIM)
    assert jnp.allclose(out_bf16.astype(jnp.float32), y_ref, atol=2e-2, rtol=2e-2)

    print("KERNEL_OK")
</pallas_src>

<mosaic_0001>
module attributes {stable_mosaic.version = 11 : i64} {
  func.func @_linear_norm_kernel(%arg0: i32, %arg1: memref<8x32xf32, #tpu.memory_space<vmem>>, %arg2: memref<32x128xf32, #tpu.memory_space<vmem>>, %arg3: memref<1x128xf32, #tpu.memory_space<vmem>>, %arg4: memref<8x128xf32, #tpu.memory_space<vmem>>) attributes {dimension_semantics = [#tpu.dimension_semantics<parallel>], iteration_bounds = array<i64: 1>, scalar_prefetch = 0 : i64, scratch_operands = 0 : i64, tpu.core_type = #tpu.core_type<tc>, window_params = [{transform_indices = @transform_0, window_bounds = array<i64: 8, 32>}, {pipeline_mode = #tpu.pipeline_mode<synchronous>, transform_indices = @transform_1, window_bounds = array<i64: 32, 128>}, {pipeline_mode = #tpu.pipeline_mode<synchronous>, transform_indices = @transform_2, window_bounds = array<i64: 1, 128>}, {transform_indices = @transform_3, window_bounds = array<i64: 8, 128>}]} {
    %c0 = arith.constant 0 : index
    %c0_0 = arith.constant 0 : index
    %0 = vector.load %arg1[%c0, %c0_0] : memref<8x32xf32, #tpu.memory_space<vmem>>, vector<8x32xf32>
    %c0_1 = arith.constant 0 : index
    %c0_2 = arith.constant 0 : index
    %1 = vector.load %arg2[%c0_1, %c0_2] : memref<32x128xf32, #tpu.memory_space<vmem>>, vector<32x128xf32>
    %cst = arith.constant dense<0.000000e+00> : vector<8x128xf32>
    %2 = tpu.matmul %0, %1, %cst {dimension_numbers = #tpu.dot_dimension_numbers<[1], [0], [0], [1], [0, 0, 1, 1], [], []>} : vector<8x32xf32>, vector<32x128xf32>, vector<8x128xf32> -> vector<8x128xf32>
    %c0_3 = arith.constant 0 : index
    %c0_4 = arith.constant 0 : index
    %3 = vector.load %arg3[%c0_3, %c0_4] : memref<1x128xf32, #tpu.memory_space<vmem>>, vector<1x128xf32>
    %4 = vector.broadcast %3 : vector<1x128xf32> to vector<8x128xf32>
    %5 = arith.addf %2, %4 : vector<8x128xf32>
    %6 = arith.mulf %5, %5 : vector<8x128xf32>
    %cst_5 = arith.constant dense<0.000000e+00> : vector<8xf32>
    %7 = vector.multi_reduction <add>, %6, %cst_5 [1] : vector<8x128xf32> to vector<8xf32>
    %8 = vector.shape_cast %7 : vector<8xf32> to vector<8x1xf32>
    %cst_6 = arith.constant 1.000000e-24 : f32
    %9 = vector.broadcast %cst_6 : f32 to vector<8x1xf32>
    %10 = arith.maximumf %8, %9 : vector<8x1xf32>
    %11 = math.rsqrt %10 : vector<8x1xf32>
    %12 = vector.broadcast %11 : vector<8x1xf32> to vector<8x128xf32>
    %13 = arith.mulf %5, %12 : vector<8x128xf32>
    %c0_7 = arith.constant 0 : index
    %c0_8 = arith.constant 0 : index
    %14 = vector.load %arg4[%c0_7, %c0_8] : memref<8x128xf32, #tpu.memory_space<vmem>>, vector<8x128xf32>
    tpu.vector_store %arg4[%c0_7, %c0_8], %13 {strides = array<i32>} : memref<8x128xf32, #tpu.memory_space<vmem>>, vector<8x128xf32>,
    return
  }
  func.func @transform_0(%arg0: i32) -> (i32, i32) {
    %c0_i32 = arith.constant 0 : i32
    %c0_i32_0 = arith.constant 0 : i32
    return %arg0, %c0_i32 : i32, i32
  }
  func.func @transform_1(%arg0: i32) -> (i32, i32) {
    %c0_i32 = arith.constant 0 : i32
    %c0_i32_0 = arith.constant 0 : i32
    %c0_i32_1 = arith.constant 0 : i32
    return %c0_i32, %c0_i32_0 : i32, i32
  }
  func.func @transform_2(%arg0: i32) -> (i32, i32) {
    %c0_i32 = arith.constant 0 : i32
    %c0_i32_0 = arith.constant 0 : i32
    %c0_i32_1 = arith.constant 0 : i32
    return %c0_i32, %c0_i32_0 : i32, i32
  }
  func.func @transform_3(%arg0: i32) -> (i32, i32) {
    %c0_i32 = arith.constant 0 : i32
    %c0_i32_0 = arith.constant 0 : i32
    return %arg0, %c0_i32 : i32, i32
  }
}

module attributes {stable_mosaic.version = 11 : i64} {
  func.func @_linear_norm_kernel(%arg0: i32, %arg1: memref<8x32xf32, #tpu.memory_space<vmem>>, %arg2: memref<32x128xf32, #tpu.memory_space<vmem>>, %arg3: memref<1x128xf32, #tpu.memory_space<vmem>>, %arg4: memref<8x128xf32, #tpu.memory_space<vmem>>) attributes {dimension_semantics = [#tpu.dimension_semantics<parallel>], iteration_bounds = array<i64: 1>, scalar_prefetch = 0 : i64, scratch_operands = 0 : i64, tpu.core_type = #tpu.core_type<tc>, window_params = [{transform_indices = @transform_0, window_bounds = array<i64: 8, 32>}, {pipeline_mode = #tpu.pipeline_mode<synchronous>, transform_indices = @transform_1, window_bounds = array<i64: 32, 128>}, {pipeline_mode = #tpu.pipeline_mode<synchronous>, transform_indices = @transform_2, window_bounds = array<i64: 1, 128>}, {transform_indices = @transform_3, window_bounds = array<i64: 8, 128>}]} {
    %c0 = arith.constant 0 : index
    %c0_0 = arith.constant 0 : index
    %0 = vector.load %arg1[%c0, %c0_0] : memref<8x32xf32, #tpu.memory_space<vmem>>, vector<8x32xf32>
    %c0_1 = arith.constant 0 : index
    %c0_2 = arith.constant 0 : index
    %1 = vector.load %arg2[%c0_1, %c0_2] : memref<32x128xf32, #tpu.memory_space<vmem>>, vector<32x128xf32>
    %cst = arith.constant dense<0.000000e+00> : vector<8x128xf32>
    %2 = tpu.matmul %0, %1, %cst {dimension_numbers = #tpu.dot_dimension_numbers<[1], [0], [0], [1], [0, 0, 1, 1], [], []>} : vector<8x32xf32>, vector<32x128xf32>, vector<8x128xf32> -> vector<8x128xf32>
    %c0_3 = arith.constant 0 : index
    %c0_4 = arith.constant 0 : index
    %3 = vector.load %arg3[%c0_3, %c0_4] : memref<1x128xf32, #tpu.memory_space<vmem>>, vector<1x128xf32>
    %4 = vector.broadcast %3 : vector<1x128xf32> to vector<8x128xf32>
    %5 = arith.addf %2, %4 : vector<8x128xf32>
    %6 = arith.mulf %5, %5 : vector<8x128xf32>
    %cst_5 = arith.constant dense<0.000000e+00> : vector<8xf32>
    %7 = vector.multi_reduction <add>, %6, %cst_5 [1] : vector<8x128xf32> to vector<8xf32>
    %8 = vector.shape_cast %7 : vector<8xf32> to vector<8x1xf32>
    %cst_6 = arith.constant 1.000000e-24 : f32
    %9 = vector.broadcast %cst_6 : f32 to vector<8x1xf32>
    %10 = arith.maximumf %8, %9 : vector<8x1xf32>
    %11 = math.rsqrt %10 : vector<8x1xf32>
    %12 = vector.broadcast %11 : vector<8x1xf32> to vector<8x128xf32>
    %13 = arith.mulf %5, %12 : vector<8x128xf32>
    %c0_7 = arith.constant 0 : index
    %c0_8 = arith.constant 0 : index
    %14 = vector.load %arg4[%c0_7, %c0_8] : memref<8x128xf32, #tpu.memory_space<vmem>>, vector<8x128xf32>
    tpu.vector_store %arg4[%c0_7, %c0_8], %13 {strides = array<i32>} : memref<8x128xf32, #tpu.memory_space<vmem>>, vector<8x128xf32>,
    return
  }
  func.func @transform_0(%arg0: i32) -> (i32, i32) {
    %c0_i32 = arith.constant 0 : i32
    %c0_i32_0 = arith.constant 0 : i32
    return %arg0, %c0_i32 : i32, i32
  }
  func.func @transform_1(%arg0: i32) -> (i32, i32) {
    %c0_i32 = arith.constant 0 : i32
    %c0_i32_0 = arith.constant 0 : i32
    %c0_i32_1 = arith.constant 0 : i32
    return %c0_i32, %c0_i32_0 : i32, i32
  }
  func.func @transform_2(%arg0: i32) -> (i32, i32) {
    %c0_i32 = arith.constant 0 : i32
    %c0_i32_0 = arith.constant 0 : i32
    %c0_i32_1 = arith.constant 0 : i32
    return %c0_i32, %c0_i32_0 : i32, i32
  }
  func.func @transform_3(%arg0: i32) -> (i32, i32) {
    %c0_i32 = arith.constant 0 : i32
    %c0_i32_0 = arith.constant 0 : i32
    return %arg0, %c0_i32 : i32, i32
  }
}

</mosaic_0001>

<bundles_post_ra>
// kernel: tpu_custom_call.1
= control target key start
LH: loop header
LB: loop body
LE: loop exit
PB: predicated region body
PF: predicated region fallthrough
CT: control target
= control target key end

     0   :  { %8 = vsyncpa [#allocation3], 0  ;;  %s282_s0 = inlined_call_operand.hbm [shape: f32[8,32], index: 0, kind: input, shape index: {}]   ;;  %s283_s1 = inlined_call_operand.hbm [shape: f32[32,128], index: 1, kind: input, shape index: {}]   ;;  %s284_s2 = inlined_call_operand.vmem [shape: f32[1,128], index: 2, kind: input, shape index: {}]   ;;  %s285_s3 = inlined_call_operand.hbm [shape: f32[8,128], index: 3, kind: output, shape index: {}]  }
   0x1   :  { %9 = vsyncpa [#allocation6], 0 }
   0x2   :  { %10 = vsyncpa [#allocation4], 0  ;;  %s243_s12 = smov [#allocation2]   ;;  %s244_s14 = smov [#allocation5]  }
   0x3   :  { %s17_s13 = sshll.u32 %s243_s12, 4  ;;  %s26_s15 = sshll.u32 %s244_s14, 4  ;;  %s18_s13 = int_to_ptr.vmem [resolvable:$true] %s17_s13  ;;  %s27_s15 = int_to_ptr.vmem [resolvable:$true] %s26_s15 }
   0x4   :  { %s185_s16 = scalar_lea.vmem %s18_s13, 128  ;;  %p190_p1 = scmp.lt.s32.totalorder %s18_s13, %s18_s13 }
   0x5   :  { %p186_p0 = scmp.ne.s32.totalorder %s18_s13, %s185_s16  ;;  %p191_p2 = scmp.lt.s32.totalorder %s185_s16, %s185_s16 }
   0x7   :  { %p192_p3 = por %p191_p2, %p190_p1 }
   0x9   :  { %p193_p4 = pnand %p192_p3, %p186_p0 }
   0xb   :  { %196 = shalt.err (!%p193_p4)
}
   0xc   :  { %20 = dma.hbm_to_vmem [thread:$0]  %s282_s0, 128, %s18_s13, [#allocation3]  }
   0xd   :  { %s205_s19 = scalar_lea.vmem %s27_s15, 512  ;;  %p210_p6 = scmp.lt.s32.totalorder %s27_s15, %s27_s15 }
   0xe   :  { %p206_p5 = scmp.ne.s32.totalorder %s27_s15, %s205_s19  ;;  %p211_p7 = scmp.lt.s32.totalorder %s205_s19, %s205_s19 }
  0x10   :  { %p212_p8 = por %p211_p7, %p210_p6 }
  0x12   :  { %p213_p9 = pnand %p212_p8, %p206_p5 }
  0x14   :  { %216 = shalt.err (!%p213_p9)
}
  0x15   :  { %s245_s20 = smov 128   ;;  %s246_s21 = smov 8  }
  0x16   :  { %32 = dma.hbm_to_vmem [thread:$0]  %s283_s1, 512, %s27_s15, [#allocation6], %s245_s20, %s245_s20, %s246_s21  }
  0x17   :  { %237 = dma.done.wait [#allocation3], 128  }
  0x18   :  { %238 = vsyncadd [#allocation3], 4294967168 }
  0x19   :  { %239 = dma.done.wait [#allocation6], 512  }
  0x1a   :  { %240 = vsyncadd [#allocation6], 4294966784  ;;  %v247_v0 = vmov 0.0   ;;  %vm248_vm0 = vmmov 0   ;;  %v45_v1 = vld [vmem:[#allocation5 + $0x18] sm:$0xff]  ;;  %v44_v2 = vld [vmem:[#allocation5 + $0x10] sm:$0xff] }
  0x1b   :  { %157 = vmatprep.subr.mxu0 %v247_v0  ;;  %165 = vmatprep.mubr.msk.f32.mxu0 %vm248_vm0, %v247_v0  ;;  %v43_v3 = vld [vmem:[#allocation5 + $0x8] sm:$0xff]  ;;  %v42_v4 = vld [vmem:[#allocation5] sm:$0xff]  ;;  %v41_v5 = vld [vmem:[#allocation2] sm:$0xff]  ;;  %vm53_vm1 = vcmask 261120   ;;  %s249_s24 = smov [#allocation7]  }
  0x1c   :  { %158 = vmatpush3.msra.mxu0 %v45_v1  ;;  %v150_v6 = vld [vmem:[%s284_s2] ss:$0 sm:$0xff]  ;;  %s140_s25 = sshll.u32 %s249_s24, 4  ;;  %s141_s25 = int_to_ptr.vmem [resolvable:$true] %s140_s25 }
  0x1d   :  { %159 = vmatprep.subr.mxu0 %v247_v0  ;;  %s217_s26 = scalar_lea.vmem %s141_s25, 128  ;;  %p222_p11 = scmp.lt.s32.totalorder %s141_s25, %s141_s25 }
  0x1e   :  { %160 = vmatpush3.msra.mxu0 %v44_v2  ;;  %p218_p10 = scmp.ne.s32.totalorder %s141_s25, %s217_s26  ;;  %p223_p12 = scmp.lt.s32.totalorder %s217_s26, %s217_s26 }
  0x1f   :  { %161 = vmatprep.subr.mxu0 %v247_v0 }
  0x20   :  { %162 = vmatpush3.msra.mxu0 %v43_v3  ;;  %p224_p13 = por %p223_p12, %p222_p11 }
  0x21   :  { %163 = vmatprep.subr.mxu0 %v247_v0 }
  0x22   :  { %164 = vmatpush3.msra.mxu0 %v42_v4  ;;  %p225_p0 = pnand %p224_p13, %p218_p10 }
  0x23   :  { %166 = vmatmul.mubr.msk.f32.vlgmr.msra.gmra.mxu0 %vm53_vm1, %v41_v5 }
  0xe3   :  { %v123_v7 = vpop.f32.mrf.mxu0 }
  0xe4   :  { %v124_v8 = vadd.f32 %v150_v6, %v123_v7 }
  0xe5   :  { %v167_v9 = vpop.f32.mrf.mxu0 }
  0xe6   :  { %v127_v10 = vmul.f32 %v124_v8, %v124_v8 }
  0xe8   :  { %128 = vadd.xlane.f32.xlu0 %v127_v10 }
 0x171   :  { %v129_v11 = vpop.xlane.xlu0 %128 }
 0x172   :  { %v130_v12 = vmax.f32 %v129_v11, 1e-24 }
 0x174   :  { %175 = vrsqrt.f32 %v130_v12 }
 0x181   :  { %v176_v13 = vpop.eup %175 }
 0x182   :  { %v132_v14 = vmul.f32 %v176_v13, %v124_v8 }
 0x184   :  { %133 = vst [vmem:[#allocation7] sm:$0xff] %v132_v14 }
 0x185   :  { %228 = shalt.err (!%p225_p0)
}
 0x186   :  { %143 = dma.vmem_to_hbm [thread:$0]  %s141_s25, 128, %s285_s3, [#allocation4]  }
 0x187   :  { %241 = dma.done.wait [#allocation4], 128  }
 0x188   :  { %242 = vsyncadd [#allocation4], 4294967168 }
 0x189   :  { %147 = vsyncpa [#allocation3], 1 }
 0x18a   :  { %148 = vsyncpa [#allocation6], 1 }
 0x18b   :  { %149 = vsyncpa [#allocation4], 1 }

// kernel: tpu_custom_call.1
= control target key start
LH: loop header
LB: loop body
LE: loop exit
PB: predicated region body
PF: predicated region fallthrough
CT: control target
= control target key end

     0   :  { %8 = vsyncpa [#allocation3], 0  ;;  %s282_s0 = inlined_call_operand.hbm [shape: f32[8,32], index: 0, kind: input, shape index: {}]   ;;  %s283_s1 = inlined_call_operand.hbm [shape: f32[32,128], index: 1, kind: input, shape index: {}]   ;;  %s284_s2 = inlined_call_operand.vmem [shape: f32[1,128], index: 2, kind: input, shape index: {}]   ;;  %s285_s3 = inlined_call_operand.hbm [shape: f32[8,128], index: 3, kind: output, shape index: {}]  }
   0x1   :  { %9 = vsyncpa [#allocation6], 0 }
   0x2   :  { %10 = vsyncpa [#allocation4], 0  ;;  %s243_s12 = smov [#allocation2]   ;;  %s244_s14 = smov [#allocation5]  }
   0x3   :  { %s17_s13 = sshll.u32 %s243_s12, 4  ;;  %s26_s15 = sshll.u32 %s244_s14, 4  ;;  %s18_s13 = int_to_ptr.vmem [resolvable:$true] %s17_s13  ;;  %s27_s15 = int_to_ptr.vmem [resolvable:$true] %s26_s15 }
   0x4   :  { %s185_s16 = scalar_lea.vmem %s18_s13, 128  ;;  %p190_p1 = scmp.lt.s32.totalorder %s18_s13, %s18_s13 }
   0x5   :  { %p186_p0 = scmp.ne.s32.totalorder %s18_s13, %s185_s16  ;;  %p191_p2 = scmp.lt.s32.totalorder %s185_s16, %s185_s16 }
   0x7   :  { %p192_p3 = por %p191_p2, %p190_p1 }
   0x9   :  { %p193_p4 = pnand %p192_p3, %p186_p0 }
   0xb   :  { %196 = shalt.err (!%p193_p4)
}
   0xc   :  { %20 = dma.hbm_to_vmem [thread:$0]  %s282_s0, 128, %s18_s13, [#allocation3]  }
   0xd   :  { %s205_s19 = scalar_lea.vmem %s27_s15, 512  ;;  %p210_p6 = scmp.lt.s32.totalorder %s27_s15, %s27_s15 }
   0xe   :  { %p206_p5 = scmp.ne.s32.totalorder %s27_s15, %s205_s19  ;;  %p211_p7 = scmp.lt.s32.totalorder %s205_s19, %s205_s19 }
  0x10   :  { %p212_p8 = por %p211_p7, %p210_p6 }
  0x12   :  { %p213_p9 = pnand %p212_p8, %p206_p5 }
  0x14   :  { %216 = shalt.err (!%p213_p9)
}
  0x15   :  { %s245_s20 = smov 128   ;;  %s246_s21 = smov 8  }
  0x16   :  { %32 = dma.hbm_to_vmem [thread:$0]  %s283_s1, 512, %s27_s15, [#allocation6], %s245_s20, %s245_s20, %s246_s21  }
  0x17   :  { %237 = dma.done.wait [#allocation3], 128  }
  0x18   :  { %238 = vsyncadd [#allocation3], 4294967168 }
  0x19   :  { %239 = dma.done.wait [#allocation6], 512  }
  0x1a   :  { %240 = vsyncadd [#allocation6], 4294966784  ;;  %v247_v0 = vmov 0.0   ;;  %vm248_vm0 = vmmov 0   ;;  %v45_v1 = vld [vmem:[#allocation5 + $0x18] sm:$0xff]  ;;  %v44_v2 = vld [vmem:[#allocation5 + $0x10] sm:$0xff] }
  0x1b   :  { %157 = vmatprep.subr.mxu0 %v247_v0  ;;  %165 = vmatprep.mubr.msk.f32.mxu0 %vm248_vm0, %v247_v0  ;;  %v43_v3 = vld [vmem:[#allocation5 + $0x8] sm:$0xff]  ;;  %v42_v4 = vld [vmem:[#allocation5] sm:$0xff]  ;;  %v41_v5 = vld [vmem:[#allocation2] sm:$0xff]  ;;  %vm53_vm1 = vcmask 261120   ;;  %s249_s24 = smov [#allocation7]  }
  0x1c   :  { %158 = vmatpush3.msra.mxu0 %v45_v1  ;;  %v150_v6 = vld [vmem:[%s284_s2] ss:$0 sm:$0xff]  ;;  %s140_s25 = sshll.u32 %s249_s24, 4  ;;  %s141_s25 = int_to_ptr.vmem [resolvable:$true] %s140_s25 }
  0x1d   :  { %159 = vmatprep.subr.mxu0 %v247_v0  ;;  %s217_s26 = scalar_lea.vmem %s141_s25, 128  ;;  %p222_p11 = scmp.lt.s32.totalorder %s141_s25, %s141_s25 }
  0x1e   :  { %160 = vmatpush3.msra.mxu0 %v44_v2  ;;  %p218_p10 = scmp.ne.s32.totalorder %s141_s25, %s217_s26  ;;  %p223_p12 = scmp.lt.s32.totalorder %s217_s26, %s217_s26 }
  0x1f   :  { %161 = vmatprep.subr.mxu0 %v247_v0 }
  0x20   :  { %162 = vmatpush3.msra.mxu0 %v43_v3  ;;  %p224_p13 = por %p223_p12, %p222_p11 }
  0x21   :  { %163 = vmatprep.subr.mxu0 %v247_v0 }
  0x22   :  { %164 = vmatpush3.msra.mxu0 %v42_v4  ;;  %p225_p0 = pnand %p224_p13, %p218_p10 }
  0x23   :  { %166 = vmatmul.mubr.msk.f32.vlgmr.msra.gmra.mxu0 %vm53_vm1, %v41_v5 }
  0xe3   :  { %v123_v7 = vpop.f32.mrf.mxu0 }
  0xe4   :  { %v124_v8 = vadd.f32 %v150_v6, %v123_v7 }
  0xe5   :  { %v167_v9 = vpop.f32.mrf.mxu0 }
  0xe6   :  { %v127_v10 = vmul.f32 %v124_v8, %v124_v8 }
  0xe8   :  { %128 = vadd.xlane.f32.xlu0 %v127_v10 }
 0x171   :  { %v129_v11 = vpop.xlane.xlu0 %128 }
 0x172   :  { %v130_v12 = vmax.f32 %v129_v11, 1e-24 }
 0x174   :  { %175 = vrsqrt.f32 %v130_v12 }
 0x181   :  { %v176_v13 = vpop.eup %175 }
 0x182   :  { %v132_v14 = vmul.f32 %v176_v13, %v124_v8 }
 0x184   :  { %133 = vst [vmem:[#allocation7] sm:$0xff] %v132_v14 }
 0x185   :  { %228 = shalt.err (!%p225_p0)
}
 0x186   :  { %143 = dma.vmem_to_hbm [thread:$0]  %s141_s25, 128, %s285_s3, [#allocation4]  }
 0x187   :  { %241 = dma.done.wait [#allocation4], 128  }
 0x188   :  { %242 = vsyncadd [#allocation4], 4294967168 }
 0x189   :  { %147 = vsyncpa [#allocation3], 1 }
 0x18a   :  { %148 = vsyncpa [#allocation6], 1 }
 0x18b   :  { %149 = vsyncpa [#allocation4], 1 }

</bundles_post_ra>
